<compile_context>
chip_gen: v7x
topology: tpu7x:2x2x1
jax: 0.10.0
libtpu: 0.0.40
codegen_flags: <defaults>
</compile_context>

<pallas_src>
import functools

import jax
import jax.numpy as jnp
from jax.experimental import pallas as pl
from jax.experimental.pallas import tpu as pltpu


def _contrastive_kernel(o1_ref, o2_ref, lbl_ref, out_ref, *,
                        margin, eps, block_rows, g, feat, valid_rows):
    """One row-block: per-sample squared distance (MXU segment-sum), hinge
    loss, ragged-row masking, and an in-kernel partial sum over the block."""
    W = g * feat
    bi = pl.program_id(0)

    # pairwise_distance: ||x1 - x2 + eps||_2, eps added element-wise
    # (matches F.pairwise_distance and hence the PyTorch module).
    diff = o1_ref[...].astype(jnp.float32) - o2_ref[...].astype(jnp.float32) + eps
    sq = diff * diff                                              # (bn, W) f32

    # 0/1 segment matrix mapping feature lanes -> packed samples, generated
    # in-kernel (range compare instead of integer division).
    lane = jax.lax.broadcasted_iota(jnp.int32, (W, g), 0)
    col = jax.lax.broadcasted_iota(jnp.int32, (W, g), 1)
    in_seg = (lane >= col * feat) & (lane < (col + 1) * feat)
    seg = jnp.where(in_seg, 1.0, 0.0).astype(jnp.bfloat16)        # exact in bf16

    # Per-sample squared distance via an explicit 3-pass bf16 split matmul
    # (== Precision.HIGH / bf16_3x; seg is exact in bf16 so only sq is split).
    s0 = sq.astype(jnp.bfloat16)
    r1 = sq - s0.astype(jnp.float32)
    s1 = r1.astype(jnp.bfloat16)
    s2 = (r1 - s1.astype(jnp.float32)).astype(jnp.bfloat16)
    d2 = jnp.dot(s0, seg, preferred_element_type=jnp.float32)
    d2 = d2 + jnp.dot(s1, seg, preferred_element_type=jnp.float32)
    d2 = d2 + jnp.dot(s2, seg, preferred_element_type=jnp.float32)  # (bn, g)

    dist = jnp.sqrt(d2)
    lbl = lbl_ref[...].astype(jnp.float32)                        # (bn, g)
    hinge = jnp.maximum(margin - dist, 0.0)
    per = lbl * d2 + (1.0 - lbl) * (hinge * hinge)                # per-sample loss

    # Mask rows past the true row count: the ragged last block reads undefined
    # VMEM, which must not contaminate the in-kernel partial sum.
    row = bi * block_rows + jax.lax.broadcasted_iota(
        jnp.int32, (block_rows, g), 0)
    per = jnp.where(row < valid_rows, per, 0.0)

    # Tiny per-block partial sum; final mean happens in the wrapper.
    out_ref[...] = jnp.sum(per, axis=0, keepdims=True)[None]      # (1, 1, g)


def _vmem_budget():
    """(input working-set budget, vmem_limit_bytes), generation-aware."""
    cap = None
    try:
        info = pltpu.get_tpu_info()
        cap = int(getattr(info, "vmem_capacity_bytes", 0)) or None
    except Exception:
        cap = None
    if cap is None or cap <= 64 * 1024 * 1024:
        # v7x-safe defaults (64 MiB VMEM/TC): keep the double-buffered inputs
        # well under half of VMEM, leave headroom for compiler scratch/spills.
        return 36 * 1024 * 1024, 56 * 1024 * 1024
    # v5e / v6e: 128 MiB VMEM -> bigger tiles, higher scoped limit.
    return 72 * 1024 * 1024, 100 * 1024 * 1024


def _auto_block_rows(rows, width, itemsize, budget_bytes):
    """Row-tile heuristic: ~8 MiB of embedding input per step, multiple-of-16
    rows, capped by the generation-aware VMEM budget (incl. headroom for the
    kernel's full-width f32 intermediates), and >= 2 balanced steps for
    non-tiny problems so v7x's second TensorCore is never idle."""
    w_pad = max(128, ((width + 127) // 128) * 128)
    # Double-buffered per-row charge: 2 embedding inputs + lane-padded label
    # tile, plus headroom for full-width f32/bf16 intermediates in the body.
    per_row = 2 * 2 * w_pad * itemsize + 2 * 128 * 4 + 3 * w_pad * 4
    cap = max(16, budget_bytes // per_row)
    target = max(512, (8 * 1024 * 1024) // max(1, w_pad * itemsize))
    bn = min(int(target), int(cap))
    bn = max(16, (bn // 16) * 16)

    if rows <= 512:
        # Tiny problem: a single (MXU-friendly, multiple-of-16) block.
        return max(16, ((rows + 15) // 16) * 16)
    if rows <= bn:
        # Mid-sized: force >= 2 balanced steps so the "parallel" grid axis can
        # shard across v7x's two TensorCores (free on v5e/v6e).
        half = (((rows + 1) // 2) + 15) // 16 * 16
        return min(half, bn)
    # Large: balance the steps (even count preferred) so no step is tiny.
    nsteps = -(-rows // bn)
    nsteps += nsteps % 2
    return max(16, ((-(-rows // nsteps)) + 15) // 16 * 16)


def contrastive_loss(output1, output2, label, *, margin=1.0, eps=1e-6,
                     block_rows=None):
    N, D = output1.shape
    assert output2.shape == (N, D)
    itemsize = jnp.dtype(output1.dtype).itemsize

    # Lane-density: pack g samples per 128-lane row when D divides 128 evenly.
    if 0 < D < 128 and 128 % D == 0 and N % (128 // D) == 0:
        g = 128 // D
    else:
        g = 1
    rows = N // g
    W = g * D

    o1v = output1.reshape(rows, W)        # contiguous reshapes: no data movement
    o2v = output2.reshape(rows, W)
    lblv = jnp.reshape(label, (rows, g))
    if not jnp.issubdtype(lblv.dtype, jnp.floating):
        lblv = lblv.astype(jnp.float32)

    budget, vmem_limit = _vmem_budget()
    if block_rows is None:
        block_rows = _auto_block_rows(rows, W, itemsize, budget)
    block_rows = int(block_rows)
    num_blocks = -(-rows // block_rows)

    kernel = functools.partial(
        _contrastive_kernel, margin=float(margin), eps=float(eps),
        block_rows=block_rows, g=int(g), feat=int(D), valid_rows=int(rows))

    # Advisory cost: 3 MXU passes of the (rows, W) x (W, g) segment-sum plus
    # the elementwise/split work; one sqrt per sample.
    cost = pl.CostEstimate(
        flops=int(3 * 2 * rows * W * g + 12 * rows * W + 8 * N),
        transcendentals=int(N),
        bytes_accessed=int(2 * N * D * itemsize
                           + rows * g * jnp.dtype(lblv.dtype).itemsize
                           + num_blocks * g * 4))

    partials = pl.pallas_call(
        kernel,
        out_shape=jax.ShapeDtypeStruct((num_blocks, 1, g), jnp.float32),
        grid_spec=pltpu.PrefetchScalarGridSpec(
            num_scalar_prefetch=0,
            grid=(num_blocks,),
            in_specs=[
                pl.BlockSpec((block_rows, W), lambda i: (i, 0)),
                pl.BlockSpec((block_rows, W), lambda i: (i, 0)),
                pl.BlockSpec((block_rows, g), lambda i: (i, 0)),
            ],
            out_specs=pl.BlockSpec((1, 1, g), lambda i: (i, 0, 0)),
        ),
        compiler_params=pltpu.CompilerParams(
            dimension_semantics=("parallel",),   # independent blocks -> 2 TCs on v7x
            vmem_limit_bytes=int(vmem_limit),
        ),
        cost_estimate=cost,
    )(o1v, o2v, lblv)

    # Final mean over exactly N samples (num_blocks * g tiny f32 partials).
    return jnp.sum(partials) / N


def _reference_loss(o1, o2, label, margin=1.0, eps=1e-6):
    diff = o1.astype(jnp.float32) - o2.astype(jnp.float32) + eps
    dist = jnp.sqrt(jnp.sum(diff * diff, axis=-1, keepdims=True))
    hinge = jnp.maximum(margin - dist, 0.0)
    lbl = label.reshape(-1, 1).astype(jnp.float32)
    return jnp.mean(lbl * dist ** 2 + (1.0 - lbl) * hinge ** 2)


if __name__ == "__main__":
    key = jax.random.PRNGKey(0)
    k1, k2, k3 = jax.random.split(key, 3)

    # N=200, D=32 exercises the lane-dense packed path (4 samples per 128-lane
    # row).  With block_rows=16 the grid has 4 "parallel" steps and a masked
    # ragged last block (rows=50 -> last step has only 2 valid rows).
    N, D = 200, 32
    output1 = jax.random.normal(k1, (N, D), dtype=jnp.float32)
    output2 = jax.random.normal(k2, (N, D), dtype=jnp.float32)
    label = jax.random.bernoulli(k3, 0.5, (N, 1)).astype(jnp.float32)

    ref = _reference_loss(output1, output2, label, margin=1.0)
    loss = contrastive_loss(output1, output2, label, margin=1.0, block_rows=16)
    loss = jax.block_until_ready(loss)
    assert jnp.allclose(loss, ref, rtol=1e-5, atol=1e-5), (loss, ref)

    # Auto-sized tile path (single multiple-of-16 block covering 50 rows).
    loss_auto = contrastive_loss(output1, output2, label, margin=1.0)
    loss_auto = jax.block_until_ready(loss_auto)
    assert jnp.allclose(loss_auto, ref, rtol=1e-5, atol=1e-5), (loss_auto, ref)

    # Larger margin so both loss branches (d^2 and the hinge term) are active.
    ref_m = _reference_loss(output1, output2, label, margin=9.0)
    loss_m = contrastive_loss(output1, output2, label, margin=9.0, block_rows=16)
    loss_m = jax.block_until_ready(loss_m)
    assert jnp.allclose(loss_m, ref_m, rtol=1e-5, atol=1e-5), (loss_m, ref_m)

    print("KERNEL_OK")
</pallas_src>

<mosaic_0001>
module attributes {stable_mosaic.version = 11 : i64} {
  func.func @_contrastive_kernel(%arg0: i32, %arg1: memref<16x128xf32, #tpu.memory_space<vmem>>, %arg2: memref<16x128xf32, #tpu.memory_space<vmem>>, %arg3: memref<16x4xf32, #tpu.memory_space<vmem>>, %arg4: memref<1x1x4xf32, #tpu.memory_space<vmem>>) attributes {dimension_semantics = [#tpu.dimension_semantics<parallel>], iteration_bounds = array<i64: 4>, scalar_prefetch = 0 : i64, scratch_operands = 0 : i64, tpu.core_type = #tpu.core_type<tc>, window_params = [{transform_indices = @transform_0, window_bounds = array<i64: 16, 128>}, {transform_indices = @transform_1, window_bounds = array<i64: 16, 128>}, {transform_indices = @transform_2, window_bounds = array<i64: 16, 4>}, {transform_indices = @transform_3, window_bounds = array<i64: 1, 1, 4>}]} {
    %c0 = arith.constant 0 : index
    %c0_0 = arith.constant 0 : index
    %0 = vector.load %arg1[%c0, %c0_0] : memref<16x128xf32, #tpu.memory_space<vmem>>, vector<16x128xf32>
    %c0_1 = arith.constant 0 : index
    %c0_2 = arith.constant 0 : index
    %1 = vector.load %arg2[%c0_1, %c0_2] : memref<16x128xf32, #tpu.memory_space<vmem>>, vector<16x128xf32>
    %2 = arith.subf %0, %1 : vector<16x128xf32>
    %cst = arith.constant 9.99999997E-7 : f32
    %3 = vector.broadcast %cst : f32 to vector<16x128xf32>
    %4 = arith.addf %2, %3 : vector<16x128xf32>
    %5 = arith.mulf %4, %4 : vector<16x128xf32>
    %6 = tpu.iota {dimensions = array<i32: 0>} : vector<128x4xi32>
    %7 = tpu.iota {dimensions = array<i32: 1>} : vector<128x4xi32>
    %c32_i32 = arith.constant 32 : i32
    %8 = vector.broadcast %c32_i32 : i32 to vector<128x4xi32>
    %9 = arith.muli %7, %8 : vector<128x4xi32>
    %10 = arith.cmpi sge, %6, %9 : vector<128x4xi32>
    %c1_i32 = arith.constant 1 : i32
    %11 = vector.broadcast %c1_i32 : i32 to vector<128x4xi32>
    %12 = arith.addi %7, %11 : vector<128x4xi32>
    %c32_i32_3 = arith.constant 32 : i32
    %13 = vector.broadcast %c32_i32_3 : i32 to vector<128x4xi32>
    %14 = arith.muli %12, %13 : vector<128x4xi32>
    %15 = arith.cmpi slt, %6, %14 : vector<128x4xi32>
    %16 = arith.andi %10, %15 : vector<128x4xi1>
    %cst_4 = arith.constant 1.000000e+00 : f32
    %cst_5 = arith.constant 0.000000e+00 : f32
    %17 = vector.broadcast %cst_4 : f32 to vector<128x4xf32>
    %18 = vector.broadcast %cst_5 : f32 to vector<128x4xf32>
    %19 = arith.select %16, %17, %18 : vector<128x4xi1>, vector<128x4xf32>
    %20 = arith.truncf %19 : vector<128x4xf32> to vector<128x4xbf16>
    %21 = arith.truncf %5 : vector<16x128xf32> to vector<16x128xbf16>
    %22 = arith.extf %21 : vector<16x128xbf16> to vector<16x128xf32>
    %23 = arith.subf %5, %22 : vector<16x128xf32>
    %24 = arith.truncf %23 : vector<16x128xf32> to vector<16x128xbf16>
    %25 = arith.extf %24 : vector<16x128xbf16> to vector<16x128xf32>
    %26 = arith.subf %23, %25 : vector<16x128xf32>
    %27 = arith.truncf %26 : vector<16x128xf32> to vector<16x128xbf16>
    %cst_6 = arith.constant dense<0.000000e+00> : vector<16x4xf32>
    %28 = tpu.matmul %21, %20, %cst_6 {dimension_numbers = #tpu.dot_dimension_numbers<[1], [0], [0], [1], [0, 0, 1, 1], [], []>} : vector<16x128xbf16>, vector<128x4xbf16>, vector<16x4xf32> -> vector<16x4xf32>
    %cst_7 = arith.constant dense<0.000000e+00> : vector<16x4xf32>
    %29 = tpu.matmul %24, %20, %cst_7 {dimension_numbers = #tpu.dot_dimension_numbers<[1], [0], [0], [1], [0, 0, 1, 1], [], []>} : vector<16x128xbf16>, vector<128x4xbf16>, vector<16x4xf32> -> vector<16x4xf32>
    %30 = arith.addf %28, %29 : vector<16x4xf32>
    %cst_8 = arith.constant dense<0.000000e+00> : vector<16x4xf32>
    %31 = tpu.matmul %27, %20, %cst_8 {dimension_numbers = #tpu.dot_dimension_numbers<[1], [0], [0], [1], [0, 0, 1, 1], [], []>} : vector<16x128xbf16>, vector<128x4xbf16>, vector<16x4xf32> -> vector<16x4xf32>
    %32 = arith.addf %30, %31 : vector<16x4xf32>
    %33 = math.sqrt %32 : vector<16x4xf32>
    %c0_9 = arith.constant 0 : index
    %c0_10 = arith.constant 0 : index
    %34 = vector.load %arg3[%c0_9, %c0_10] : memref<16x4xf32, #tpu.memory_space<vmem>>, vector<16x4xf32>
    %cst_11 = arith.constant 1.000000e+00 : f32
    %35 = vector.broadcast %cst_11 : f32 to vector<16x4xf32>
    %36 = arith.subf %35, %33 : vector<16x4xf32>
    %cst_12 = arith.constant 0.000000e+00 : f32
    %37 = vector.broadcast %cst_12 : f32 to vector<16x4xf32>
    %38 = arith.maximumf %36, %37 : vector<16x4xf32>
    %39 = arith.mulf %34, %32 : vector<16x4xf32>
    %cst_13 = arith.constant 1.000000e+00 : f32
    %40 = vector.broadcast %cst_13 : f32 to vector<16x4xf32>
    %41 = arith.subf %40, %34 : vector<16x4xf32>
    %42 = arith.mulf %38, %38 : vector<16x4xf32>
    %43 = arith.mulf %41, %42 : vector<16x4xf32>
    %44 = arith.addf %39, %43 : vector<16x4xf32>
    %c16_i32 = arith.constant 16 : i32
    %45 = arith.muli %arg0, %c16_i32 : i32
    %46 = tpu.iota {dimensions = array<i32: 0>} : vector<16x4xi32>
    %47 = vector.broadcast %45 : i32 to vector<16x4xi32>
    %48 = arith.addi %47, %46 : vector<16x4xi32>
    %c50_i32 = arith.constant 50 : i32
    %49 = vector.broadcast %c50_i32 : i32 to vector<16x4xi32>
    %50 = arith.cmpi slt, %48, %49 : vector<16x4xi32>
    %cst_14 = arith.constant 0.000000e+00 : f32
    %51 = vector.broadcast %cst_14 : f32 to vector<16x4xf32>
    %52 = arith.select %50, %44, %51 : vector<16x4xi1>, vector<16x4xf32>
    %cst_15 = arith.constant dense<0.000000e+00> : vector<4xf32>
    %53 = vector.multi_reduction <add>, %52, %cst_15 [0] : vector<16x4xf32> to vector<4xf32>
    %54 = vector.shape_cast %53 : vector<4xf32> to vector<1x4xf32>
    %55 = vector.shape_cast %54 : vector<1x4xf32> to vector<1x1x4xf32>
    %c0_16 = arith.constant 0 : index
    %c0_17 = arith.constant 0 : index
    %c0_18 = arith.constant 0 : index
    %56 = vector.load %arg4[%c0_16, %c0_17, %c0_18] : memref<1x1x4xf32, #tpu.memory_space<vmem>>, vector<1x1x4xf32>
    tpu.vector_store %arg4[%c0_16, %c0_17, %c0_18], %55 {strides = array<i32>} : memref<1x1x4xf32, #tpu.memory_space<vmem>>, vector<1x1x4xf32>,
    return
  }
  func.func @transform_0(%arg0: i32) -> (i32, i32) {
    %c0_i32 = arith.constant 0 : i32
    %c0_i32_0 = arith.constant 0 : i32
    return %arg0, %c0_i32 : i32, i32
  }
  func.func @transform_1(%arg0: i32) -> (i32, i32) {
    %c0_i32 = arith.constant 0 : i32
    %c0_i32_0 = arith.constant 0 : i32
    return %arg0, %c0_i32 : i32, i32
  }
  func.func @transform_2(%arg0: i32) -> (i32, i32) {
    %c0_i32 = arith.constant 0 : i32
    %c0_i32_0 = arith.constant 0 : i32
    return %arg0, %c0_i32 : i32, i32
  }
  func.func @transform_3(%arg0: i32) -> (i32, i32, i32) {
    %c0_i32 = arith.constant 0 : i32
    %c0_i32_0 = arith.constant 0 : i32
    %c0_i32_1 = arith.constant 0 : i32
    return %arg0, %c0_i32, %c0_i32_0 : i32, i32, i32
  }
}

</mosaic_0001>

<bundles_post_ra>
// kernel: tpu_custom_call.1
= control target key start
LH: loop header
LB: loop body
LE: loop exit
PB: predicated region body
PF: predicated region fallthrough
CT: control target
= control target key end

     0   :  { %8 = vsyncpa [#allocation3], 0  ;;  %s1382_s0 = inlined_call_operand.vmem [shape: f32[50,128], index: 0, kind: input, shape index: {}]   ;;  %s1383_s1 = inlined_call_operand.hbm [shape: f32[50,128], index: 1, kind: input, shape index: {}]   ;;  %s1384_s2 = inlined_call_operand.vmem [shape: f32[50,4], index: 2, kind: input, shape index: {}]   ;;  %s1385_s3 = inlined_call_operand.hbm [shape: f32[4,1,4], index: 3, kind: output, shape index: {}]  }
   0x1   :  { %10 = vsyncpa [#allocation3 + $0x1], 0 }
   0x2   :  { %11 = vsyncpa [#allocation4], 0 }
   0x3   :  { %13 = vsyncpa [#allocation4 + $0x1], 0  ;;  %s1011_s12 = smov 0   ;;  %s1013_s13 = smov 0  }
   0x4   :  { %s1015_s14 = smov 0   ;;  %s1017_s15 = smov 0  }
   0x5 LB: > { %s1032_s16 = sadd.s32 4294967295, %s982_s15   ;;  %s677_s17 = sadd.s32 4294967294, %s982_s15   ;;  %s982_s15 = sphi %s1017_s15, %s1411_s15   ;;  %s978_s14 = sphi %s1015_s14, %s1410_s14   ;;  %s974_s13 = sphi %s1013_s13, %s1409_s13   ;;  %s970_s12 = sphi %s1011_s12, %s1408_s12  }
   0x6   : > { %s1036_s18 = sadd.s32 1, %s982_s15   ;;  %s52_s19 = sadd.s32 1, %s978_s14 }
   0x7   : > { %s49_s20 = ssub.s32 %s982_s15, %s1036_s18  ;;  %p59_p0 = scmp.ne.s32.totalorder %s978_s14, %s974_s13 }
   0x8   : > { %p50_p1 = scmp.eq.s32.totalorder %s49_s20, 0  ;;  %p60_p2 = scmp.eq.s32.totalorder %s982_s15, 0 }
   0x9   : > { %p65_p3 = scmp.ne.s32.totalorder %s974_s13, %s970_s12  ;;  %p66_p4 = scmp.eq.s32.totalorder %s1032_s16, 0 }
   0xa   : > { %s1048_s21 = scalar_select %p50_p1, %s978_s14, %s52_s19  }
   0xb   : > { %p61_p5 = por %p60_p2, %p59_p0  ;;  %p1050_p6 = por %p66_p4, %p65_p3 }
   0xc   : > { %p115_p7 = scmp.eq.s32.totalorder %s1032_s16, 3  ;;  %p121_p8 = scmp.eq.s32.totalorder %s677_s17, 3 }
   0xd   : > { %p679_p11 = scmp.ge.s32.totalorder %s982_s15, 4 }
   0xe   : > { %p1055_p9 = por %p115_p7, %p59_p0  ;;  %p1059_p10 = por %p121_p8, %p65_p3 }
   0xf   : > { %137 = sbr.rel (%p679_p11) target bundleno = 57 (0x39), region = 16 }
  0x10   : > { %s1389_s24 = scalar_select %p1059_p10, 1, 0 }
  0x16   : > { %157 = sbr.rel (!%p61_p5) target bundleno = 57 (0x39), region = 24  ;;  %s158_s25 = sand.u32 (%p61_p5), 1, %s978_s14  }
  0x17   : > { %s681_s26 = sshll.u32 (%p61_p5), %s982_s15, 1  ;;  %s680_s27 = sshll.u32 (%p61_p5), %s158_s25, 4 }
  0x18   : > { %s164_s28 = ssub.s32 (%p61_p5), 7, %s681_s26  ;;  %s1069_s4 = scalar_lea.sflag (%p61_p5), [#allocation3], %s158_s25 }
  0x19   : > { %p165_p12 = scmp.lt.s32.totalorder (%p61_p5), %s164_s28, 2  ;;  %s162_s5 = scalar_lea.vmem (%p61_p5), [#allocation2], %s680_s27 }
  0x1d   : > { %s1413_s28 = smov (!%p165_p12, %s164_s28), 2 }
  0x1e   : > { %s1066_s29 = sshll.u32 %s1413_s28, 7 }
  0x1f   : > { %s169_s30 = ssub.s32 256, %s1066_s29 }
  0x20   : > { %170 = vsyncadd %s1069_s4, %s169_s30  ;;  %p683_p13 = scmp.ne.s32.totalorder %s1066_s29, 0  ;;  %s745_s6 = sshll.u32 %s982_s15, 8 }
  0x21   : > { %s1077_s9 = scalar_lea.hbm %s1383_s1, %s745_s6  ;;  %s175_s10 = sshll.u32 %s162_s5, 4  ;;  %s1079_s10 = int_to_ptr.vmem [resolvable:$true] %s175_s10 }
  0x22   : > { %s888_s11 = scalar_lea.hbm %s1077_s9, %s1066_s29  ;;  %s892_s20 = scalar_lea.hbm %s1383_s1, 896 }
  0x23   : > { %p889_p0 = scmp.ne.s32.totalorder %s1077_s9, %s888_s11  ;;  %p893_p3 = scmp.lt.u32.totalorder %s1077_s9, %s1383_s1 }
  0x24   : > { %p894_p4 = scmp.lt.u32.totalorder %s892_s20, %s888_s11  ;;  %p896_p7 = scmp.lt.u32.totalorder %s888_s11, %s1077_s9 }
  0x25   : > { %p890_p1 = pnand %p889_p0, %p683_p13 }
  0x26   : > { %p895_p5 = por %p894_p4, %p893_p3 }
  0x27   : > { %p891_p2 = pneg %p890_p1 }
  0x28   : > { %p897_p8 = por %p896_p7, %p895_p5 }
  0x2a   : > { %p898_p11 = pnand %p897_p8, %p891_p2 }
  0x2c   : > { %901 = shalt.err (!%p898_p11)
}
  0x2d   : > { %s902_s27 = scalar_lea.vmem %s1079_s10, %s1066_s29  ;;  %s984_s28 = smov [#allocation2]  }
  0x2e   : > { %p903_p12 = scmp.ne.s32.totalorder %s1079_s10, %s902_s27  ;;  %s906_s30 = sshll.u32 %s984_s28, 4  ;;  %s907_s30 = int_to_ptr.vmem [resolvable:$false] %s906_s30 }
  0x2f   : > { %s908_s5 = scalar_lea.vmem %s907_s30, 512  ;;  %p909_p10 = scmp.lt.s32.totalorder %s1079_s10, %s907_s30 }
  0x30   : > { %p904_p0 = pnand %p903_p12, %p683_p13  ;;  %p910_p3 = scmp.lt.s32.totalorder %s908_s5, %s902_s27 }
  0x32   : > { %p905_p1 = pneg %p904_p0  ;;  %p911_p4 = por %p910_p3, %p909_p10 }
  0x34   : > { %p912_p5 = pnand %p911_p4, %p905_p1 }
  0x36   : > { %915 = shalt.err (!%p912_p5)
}
  0x37   : > { %s985_s6 = smov 128   ;;  %s986_s7 = smov 8  }
  0x38   : > { %181 = dma.hbm_to_vmem [thread:$0]  (%p683_p13), %s1077_s9, %s1066_s29, %s1079_s10, %s1069_s4, %s985_s6, %s985_s6, %s986_s7  }
  0x39 PF: > { %p687_p2 = scmp.ge.s32.totalorder %s982_s15, 1  ;;  %p200_p7 = scmp.lt.s32.totalorder %s982_s15, 5 }
  0x3b   : > { %p201_p8 = pnand %p687_p2, %p200_p7 }
  0x3c   : > { %s1109_s8 = sand.u32 (!%p201_p8), 1, %s974_s13   ;;  %v294_v0 = vlaneseq (!%p201_p8) }
  0x3d   : > { %204 = sbr.rel (%p201_p8) target bundleno = 413 (0x19d), region = 32  ;;  %s688_s11 = sshll.u32 (!%p201_p8), %s1109_s8, 4 }
  0x3e   : > { %s207_s17 = scalar_lea.sflag (!%p201_p8), [#allocation3], %s1109_s8  ;;  %s1113_s19 = scalar_lea.vmem (!%p201_p8), [#allocation2], %s688_s11 }
  0x44   : > { %961 = dma.done.wait (%p1050_p6), %s207_s17, 256  }
  0x45   : > { %963 = vsyncadd (%p1050_p6), %s207_s17, 4294967040  ;;  %s689_s29 = sshll.u32 %s1032_s16, 1  ;;  %v987_v1 = vmov 0.0   ;;  %v1122_v2 = vshrl.u32 %v294_v0, 7  ;;  %v312_v3 = vand.u32 127, %v294_v0  ;;  %vm1386_vm0 = vmmov 0  }
  0x46   : > { %793 = vmatprep.subr.bf16.mxu0 %v987_v1  ;;  %773 = vmatprep.subr.bf16.mxu1 %v987_v1  ;;  %p255_p10 = scmp.lt.s32.totalorder %s689_s29, 6  ;;  %v989_v14 = vmov 1.0|1.0   ;;  %v286_v24 = vld [vmem:[%s1113_s19] sm:$0xff]  ;;  %v287_v25 = vld [vmem:[%s1113_s19 + $0x8] sm:$0xff]  ;;  %s741_s27 = sshll.u32 %s1032_s16, 4 }
  0x47   : > { %809 = vmatprep.mubr.msk.bf16.mxu0 %vm1386_vm0, %v987_v1  ;;  %789 = vmatprep.mubr.msk.bf16.mxu1 %vm1386_vm0, %v987_v1  ;;  %v1129_v4 = vadd.s32 8, %v1122_v2  ;;  %v1131_v5 = vmul.u32 32, %v312_v3  ;;  %v330_v6 = vadd.s32 1, %v312_v3  ;;  %v297_v7 = vadd.s32 16, %v1122_v2  ;;  %s249_s28 = scalar_lea.vmem [#allocation5], %s1109_s8  ;;  %s1339_s7 = scalar_lea.hbm %s1385_s3, %s741_s27 }
  0x48   : > { %v298_v9 = vadd.s32 24, %v1122_v2  ;;  %s1415_s29 = smov (!%p255_p10, %s689_s29), 6  ;;  %v299_v10 = vadd.s32 32, %v1122_v2  ;;  %v300_v11 = vadd.s32 40, %v1122_v2  ;;  %v301_v13 = vadd.s32 48, %v1122_v2  ;;  %s587_s30 = sshll.u32 %s249_s28, 4  ;;  %s1341_s30 = int_to_ptr.vmem [resolvable:$true] %s587_s30 }
  0x49   : > { %vm314_vm1 = vcmp.ge.s32.totalorder %v1122_v2, %v1131_v5  ;;  %v1136_v8 = vmul.u32 32, %v330_v6  ;;  %vm315_vm2 = vcmp.ge.s32.totalorder %v1129_v4, %v1131_v5  ;;  %vm316_vm6 = vcmp.ge.s32.totalorder %v297_v7, %v1131_v5  ;;  %s690_s22 = sshll.u32 %s1415_s29, 3  ;;  %s575_s11 = scalar_lea.sflag [#allocation4], %s1109_s8 }
  0x4a   : > { %vm317_vm9 = vcmp.ge.s32.totalorder %v298_v9, %v1131_v5  ;;  %vm318_vm13 = vcmp.ge.s32.totalorder %v299_v10, %v1131_v5  ;;  %v302_v15 = vadd.s32 56, %v1122_v2  ;;  %v303_v17 = vadd.s32 64, %v1122_v2  ;;  %s258_s10 = scalar_lea.vmem %s1382_s0, %s690_s22  ;;  %s277_s26 = scalar_lea.vmem %s1384_s2, %s690_s22 }
  0x4b   : > { %vm332_vm3 = vcmp.lt.s32.totalorder %v1122_v2, %v1136_v8  ;;  %vm333_vm4 = vcmp.lt.s32.totalorder %v1129_v4, %v1136_v8  ;;  %vm334_vm7 = vcmp.lt.s32.totalorder %v297_v7, %v1136_v8  ;;  %vm335_vm10 = vcmp.lt.s32.totalorder %v298_v9, %v1136_v8  ;;  %v284_v21 = vld [vmem:[%s258_s10] sm:$0xff]  ;;  %v285_v22 = vld [vmem:[%s258_s10 + $0x8] sm:$0xff]  ;;  %s916_s17 = scalar_lea.vmem %s1341_s30, 16  ;;  %s990_s19 = smov [#allocation5]  }
  0x4c   : > { %vm348_vm5 = vmand %vm314_vm1, %vm332_vm3  ;;  %vm336_vm14 = vcmp.lt.s32.totalorder %v299_v10, %v1136_v8  ;;  %vm319_vm1 = vcmp.ge.s32.totalorder %v300_v11, %v1131_v5  ;;  %v304_v18 = vadd.s32 72, %v1122_v2  ;;  %v305_v20 = vadd.s32 80, %v1122_v2  ;;  %v538_v57 = vld [vmem:[%s277_s26] sm:$0xff]  ;;  %v539_v61 = vld [vmem:[%s277_s26 + $0x8] sm:$0xff]  ;;  %p917_p6 = scmp.ne.s32.totalorder %s1341_s30, %s916_s17  ;;  %s920_s29 = sshll.u32 %s990_s19, 4  ;;  %s921_s29 = int_to_ptr.vmem [resolvable:$false] %s920_s29 }
  0x4d   : > { %vm349_vm8 = vmand %vm315_vm2, %vm333_vm4  ;;  %vm337_vm2 = vcmp.lt.s32.totalorder %v300_v11, %v1136_v8  ;;  %v306_v23 = vadd.s32 88, %v1122_v2  ;;  %v307_v27 = vadd.s32 96, %v1122_v2  ;;  %v288_v28 = vsub.f32 %v284_v21, %v286_v24  ;;  %s922_s16 = scalar_lea.vmem %s921_s29, 32  ;;  %p923_p12 = scmp.lt.s32.totalorder %s1341_s30, %s921_s29 }
  0x4e   : > { %vm1153_vm11 = vmpackc.low %vm349_vm8, %vm348_vm5  ;;  %vm320_vm5 = vcmp.ge.s32.totalorder %v301_v13, %v1131_v5  ;;  %vm321_vm8 = vcmp.ge.s32.totalorder %v302_v15, %v1131_v5  ;;  %v289_v29 = vsub.f32 %v285_v22, %v287_v25  ;;  %v308_v30 = vadd.s32 104, %v1122_v2  ;;  %p918_p13 = pnand %p917_p6, %p1055_p9  ;;  %p924_p0 = scmp.lt.s32.totalorder %s922_s16, %s916_s17 }
  0x4f   : > { %794 = vmatpush3.bf16.msk.msra.mxu0 %vm1153_vm11, %v989_v14  ;;  %vm350_vm12 = vmand %vm316_vm6, %vm334_vm7  ;;  %774 = vmatpush3.bf16.msk.msra.mxu1 %vm1153_vm11, %v989_v14  ;;  %vm338_vm6 = vcmp.lt.s32.totalorder %v301_v13, %v1136_v8  ;;  %vm343_vm0 = vcmp.lt.s32.totalorder %v306_v23, %v1136_v8  ;;  %v290_v32 = vadd.f32 1e-06, %v288_v28  ;;  %v309_v34 = vadd.s32 112, %v1122_v2 }
  0x50   : > { %795 = vmatprep.subr.bf16.mxu0 %v987_v1  ;;  %vm351_vm15 = vmand %vm317_vm9, %vm335_vm10  ;;  %775 = vmatprep.subr.bf16.mxu1 %v987_v1  ;;  %vm339_vm9 = vcmp.lt.s32.totalorder %v302_v15, %v1136_v8  ;;  %v291_v33 = vadd.f32 1e-06, %v289_v29  ;;  %v310_v36 = vadd.s32 120, %v1122_v2  ;;  %v546_v16 = vsub.f32 1.0, %v538_v57  ;;  %p919_p11 = pneg %p918_p13  ;;  %p925_p1 = por %p924_p0, %p923_p12 }
  0x51   : > { %vm1168_vm3 = vmpackc.low %vm351_vm15, %vm350_vm12  ;;  %v292_v37 = vmul.f32 %v290_v32, %v290_v32 }
  0x52   : > { %vm352_vm4 = vmand %vm318_vm13, %vm336_vm14  ;;  %vm322_vm13 = vcmp.ge.s32.totalorder %v303_v17, %v1131_v5  ;;  %vm340_vm14 = vcmp.lt.s32.totalorder %v303_v17, %v1136_v8  ;;  %v293_v38 = vmul.f32 %v291_v33, %v291_v33  ;;  %p926_p3 = pnand %p925_p1, %p919_p11 }
  0x53   : > { %796 = vmatpush3.bf16.msk.msra.mxu0 %vm1168_vm3, %v989_v14  ;;  %vm353_vm7 = vmand %vm319_vm1, %vm337_vm2  ;;  %776 = vmatpush3.bf16.msk.msra.mxu1 %vm1168_vm3, %v989_v14  ;;  %vm323_vm1 = vcmp.ge.s32.totalorder %v304_v18, %v1131_v5  ;;  %vm341_vm2 = vcmp.lt.s32.totalorder %v304_v18, %v1136_v8 }
  0x54   : > { %797 = vmatprep.subr.bf16.mxu0 %v987_v1  ;;  %vm1191_vm10 = vmpackc.low %vm353_vm7, %vm352_vm4  ;;  %777 = vmatprep.subr.bf16.mxu1 %v987_v1  ;;  %vm342_vm7 = vcmp.lt.s32.totalorder %v305_v20, %v1136_v8  ;;  %v388_v40 = vpack.c.bf16 %v293_v38, %v292_v37 }
  0x55   : > { %vm354_vm12 = vmand %vm320_vm5, %vm338_vm6  ;;  %vm324_vm6 = vcmp.ge.s32.totalorder %v305_v20, %v1131_v5  ;;  %v547_v20 = vsub.f32 1.0, %v539_v61 }
  0x56   : > { %vm355_vm15 = vmand %vm321_vm8, %vm339_vm9  ;;  %vm325_vm9 = vcmp.ge.s32.totalorder %v306_v23, %v1131_v5  ;;  %v389_v41 = vunpack.c.l.bf16 %v388_v40  ;;  %v390_v42 = vunpack.c.h.bf16 %v388_v40 }
  0x57   : > { %798 = vmatpush3.bf16.msk.msra.mxu0 %vm1191_vm10, %v989_v14  ;;  %vm1210_vm4 = vmpackc.low %vm355_vm15, %vm354_vm12  ;;  %778 = vmatpush3.bf16.msk.msra.mxu1 %vm1191_vm10, %v989_v14  ;;  %vm326_vm15 = vcmp.ge.s32.totalorder %v307_v27, %v1131_v5 }
  0x58   : > { %799 = vmatprep.subr.bf16.mxu0 %v987_v1  ;;  %vm356_vm5 = vmand %vm322_vm13, %vm340_vm14  ;;  %779 = vmatprep.subr.bf16.mxu1 %v987_v1  ;;  %v391_v44 = vsub.f32 %v292_v37, %v389_v41  ;;  %v392_v45 = vsub.f32 %v293_v38, %v390_v42 }
  0x59   : > { %vm357_vm8 = vmand %vm323_vm1, %vm341_vm2  ;;  %vm344_vm1 = vcmp.lt.s32.totalorder %v307_v27, %v1136_v8  ;;  %vm327_vm2 = vcmp.ge.s32.totalorder %v308_v30, %v1131_v5 }
  0x5a   : > { %vm1224_vm12 = vmpackc.low %vm357_vm8, %vm356_vm5  ;;  %vm345_vm5 = vcmp.lt.s32.totalorder %v308_v30, %v1136_v8  ;;  %vm328_vm8 = vcmp.ge.s32.totalorder %v309_v34, %v1131_v5  ;;  %v393_v46 = vpack.c.bf16 %v392_v45, %v391_v44 }
  0x5b   : > { %800 = vmatpush3.bf16.msk.msra.mxu0 %vm1210_vm4, %v989_v14  ;;  %vm358_vm13 = vmand %vm324_vm6, %vm342_vm7  ;;  %780 = vmatpush3.bf16.msk.msra.mxu1 %vm1210_vm4, %v989_v14 }
  0x5c   : > { %801 = vmatprep.subr.bf16.mxu0 %v987_v1  ;;  %vm359_vm14 = vmand %vm325_vm9, %vm343_vm0  ;;  %781 = vmatprep.subr.bf16.mxu1 %v987_v1  ;;  %vm346_vm9 = vcmp.lt.s32.totalorder %v309_v34, %v1136_v8  ;;  %v394_v47 = vunpack.c.l.bf16 %v393_v46  ;;  %v395_v48 = vunpack.c.h.bf16 %v393_v46 }
  0x5d   : > { %vm1241_vm6 = vmpackc.low %vm359_vm14, %vm358_vm13  ;;  %vm329_vm13 = vcmp.ge.s32.totalorder %v310_v36, %v1131_v5  ;;  %vm347_vm14 = vcmp.lt.s32.totalorder %v310_v36, %v1136_v8 }
  0x5e   : > { %vm360_vm0 = vmand %vm326_vm15, %vm344_vm1  ;;  %v396_v49 = vsub.f32 %v391_v44, %v394_v47  ;;  %v397_v50 = vsub.f32 %v392_v45, %v395_v48 }
  0x5f   : > { %802 = vmatpush3.bf16.msk.msra.mxu0 %vm1224_vm12, %v989_v14  ;;  %vm361_vm7 = vmand %vm327_vm2, %vm345_vm5  ;;  %782 = vmatpush3.bf16.msk.msra.mxu1 %vm1224_vm12, %v989_v14 }
  0x60   : > { %803 = vmatprep.subr.bf16.mxu0 %v987_v1  ;;  %783 = vmatprep.subr.bf16.mxu1 %v987_v1  ;;  %vm1262_vm15 = vmpackc.low %vm361_vm7, %vm360_vm0  ;;  %vm1406_vm0 = vmmov 0   ;;  %v398_v51 = vpack.c.bf16 %v397_v50, %v396_v49  ;;  %vm562_vm7 = vcmask 31744  }
  0x61   : > { %vm362_vm1 = vmand %vm328_vm8, %vm346_vm9  ;;  %vm572_vm8 = vcmask 24576  }
  0x62   : > { %vm363_vm2 = vmand %vm329_vm13, %vm347_vm14 }
  0x63   : > { %804 = vmatpush3.bf16.msk.msra.mxu0 %vm1241_vm6, %v989_v14  ;;  %784 = vmatpush3.bf16.msk.msra.mxu1 %vm1241_vm6, %v989_v14  ;;  %vm1275_vm5 = vmpackc.low %vm363_vm2, %vm362_vm1 }
  0x64   : > { %805 = vmatprep.subr.bf16.mxu0 %v987_v1  ;;  %785 = vmatprep.subr.bf16.mxu1 %v987_v1 }
  0x67   : > { %806 = vmatpush3.bf16.msk.msra.mxu0 %vm1262_vm15, %v989_v14  ;;  %786 = vmatpush3.bf16.msk.msra.mxu1 %vm1262_vm15, %v989_v14 }
  0x68   : > { %807 = vmatprep.subr.bf16.mxu0 %v987_v1  ;;  %787 = vmatprep.subr.bf16.mxu1 %v987_v1 }
  0x6b   : > { %808 = vmatpush3.bf16.msk.msra.mxu0 %vm1275_vm5, %v989_v14  ;;  %788 = vmatpush3.bf16.msk.msra.mxu1 %vm1275_vm5, %v989_v14 }
  0x6c   : > { %813 = vmatprep.subr.bf16.mxu0 %v987_v1 }
  0x6e   : > { %810 = vmatmul.mubr.bf16.vlgmr.msra.gmra.mrb[0].mxu0 %v388_v40  ;;  %790 = vmatmul.mubr.bf16.vlgmr.msra.gmra.mrb[0].mxu1 %v393_v46 }
  0x6f   : > { %814 = vmatpush3.bf16.msk.msra.mxu0 %vm1153_vm11, %v989_v14  ;;  %829 = vmatprep.mubr.msk.bf16.mxu0 %vm1406_vm0, %v987_v1 }
  0x70   : > { %815 = vmatprep.subr.bf16.mxu0 %v987_v1 }
  0x73   : > { %816 = vmatpush3.bf16.msk.msra.mxu0 %vm1168_vm3, %v989_v14 }
  0x74   : > { %817 = vmatprep.subr.bf16.mxu0 %v987_v1 }
  0x77   : > { %818 = vmatpush3.bf16.msk.msra.mxu0 %vm1191_vm10, %v989_v14 }
  0x78   : > { %819 = vmatprep.subr.bf16.mxu0 %v987_v1 }
  0x7b   : > { %820 = vmatpush3.bf16.msk.msra.mxu0 %vm1210_vm4, %v989_v14 }
  0x7c   : > { %821 = vmatprep.subr.bf16.mxu0 %v987_v1 }
  0x7f   : > { %822 = vmatpush3.bf16.msk.msra.mxu0 %vm1224_vm12, %v989_v14 }
  0x80   : > { %823 = vmatprep.subr.bf16.mxu0 %v987_v1 }
  0x83   : > { %824 = vmatpush3.bf16.msk.msra.mxu0 %vm1241_vm6, %v989_v14 }
  0x84   : > { %825 = vmatprep.subr.bf16.mxu0 %v987_v1 }
  0x87   : > { %826 = vmatpush3.bf16.msk.msra.mxu0 %vm1262_vm15, %v989_v14 }
  0x88   : > { %827 = vmatprep.subr.bf16.mxu0 %v987_v1 }
  0x8b   : > { %828 = vmatpush3.bf16.msk.msra.mxu0 %vm1275_vm5, %v989_v14  ;;  %v555_v14 = vstv %s741_s27 }
  0x8c   : > { %v556_v19 = vadd.s32 %v555_v14, %v1122_v2  ;;  %v557_v23 = vadd.s32 %v555_v14, %v1129_v4 }
  0x8e   : > { %830 = vmatmul.mubr.bf16.vlgmr.msra.gmra.mrb[0].mxu0 %v398_v51  ;;  %vm558_vm12 = vcmp.lt.s32.totalorder %v556_v19, 50  ;;  %vm559_vm6 = vcmp.lt.s32.totalorder %v557_v23, 50 }
 0x141   : > { %v433_v52 = vpop.f32.mrb[0].mxu1 }
 0x142   : > { %v791_v53 = vpop.f32.mrb[1].mxu1 }
 0x143   : > { %v436_v54 = vpop.f32.mrb[2].mxu1 }
 0x144   : > { %v792_v55 = vpop.f32.mrb[3].mxu1 }
 0x161   : > { %v515_v56 = vpop.f32.mrb[0].mxu0 }
 0x162   : > { %v833_v58 = vadd.f32 %v515_v56, %v433_v52  ;;  %v831_v59 = vpop.f32.mrb[1].mxu0 }
 0x163   : > { %v518_v60 = vpop.f32.mrb[2].mxu0 }
 0x164   : > { %884 = vrsqrt.f32 %v833_v58  ;;  %v834_v62 = vadd.f32 %v518_v60, %v436_v54  ;;  %v832_v63 = vpop.f32.mrb[3].mxu0  ;;  %v544_v0 = vmul.f32 %v833_v58, %v538_v57  ;;  %vm526_vm11 = vcmp.eq.f32.partialorder %v833_v58, inf }
 0x165   : > { %v529_v7 = vand.u32 2147483648, %v833_v58  ;;  %vm528_vm3 = vcmp.eq.f32.partialorder %v833_v58, 0.0 }
 0x166   : > { %886 = vrsqrt.f32 %v834_v62  ;;  %v545_v1 = vmul.f32 %v834_v62, %v539_v61  ;;  %vm533_vm10 = vcmp.eq.f32.partialorder %v834_v62, inf  ;;  %v536_v11 = vand.u32 2147483648, %v834_v62 }
 0x167   : > { %vm535_vm4 = vcmp.eq.f32.partialorder %v834_v62, 0.0 }
 0x16e   : > { %v885_v3 = vpop.eup %884 }
 0x16f   : > { %v525_v5 = vmul.f32 %v885_v3, %v833_v58 }
 0x170   : > { %v887_v6 = vpop.eup %886 }
 0x171   : > { %v527_v8 = vsel %vm526_vm11, %v833_v58, %v525_v5  ;;  %v532_v9 = vmul.f32 %v887_v6, %v834_v62 }
 0x172   : > { %v530_v10 = vsel %vm528_vm3, %v529_v7, %v527_v8 }
 0x173   : > { %v534_v12 = vsel %vm533_vm10, %v834_v62, %v532_v9  ;;  %v540_v13 = vsub.f32 1.0, %v530_v10 }
 0x174   : > { %v537_v15 = vsel %vm535_vm4, %v536_v11, %v534_v12 }
 0x175   : > { %v541_v17 = vsub.f32 1.0, %v537_v15  ;;  %v542_v18 = vmax.f32 %v540_v13, 0.0 }
 0x177   : > { %v543_v21 = vmax.f32 %v541_v17, 0.0  ;;  %v548_v22 = vmul.f32 %v542_v18, %v542_v18 }
 0x179   : > { %v549_v24 = vmul.f32 %v543_v21, %v543_v21  ;;  %v550_v25 = vmul.f32 %v548_v22, %v546_v16 }
 0x17b   : > { %v551_v26 = vmul.f32 %v549_v24, %v547_v20  ;;  %v552_v27 = vadd.f32 %v550_v25, %v544_v0 }
 0x17d   : > { %v553_v28 = vadd.f32 %v551_v26, %v545_v1  ;;  %v560_v29 = vsel %vm558_vm12, %v552_v27, 0.0 }
 0x17e   : > { %v563_v31 = vsel %vm562_vm7, %v560_v29, 0.0 }
 0x17f   : > { %v561_v30 = vsel %vm559_vm6, %v553_v28, 0.0 }
 0x180   : > { %v564_v2 = vsel %vm562_vm7, %v561_v30, 0.0 }
 0x181   : > { %v565_v32 = vadd.f32 %v564_v2, %v563_v31 }
 0x183   : > { %v566_v33 = vrot.slane %v565_v32, 4 }
 0x185   : > { %v567_v34 = vadd.f32 %v566_v33, %v565_v32 }
 0x187   : > { %v568_v4 = vrot.slane %v567_v34, 2 }
 0x189   : > { %v569_v35 = vadd.f32 %v568_v4, %v567_v34 }
 0x18b   : > { %v570_v36 = vrot.slane %v569_v35, 1 }
 0x18d   : > { %v571_v37 = vadd.f32 %v570_v36, %v569_v35 }
 0x18f   : > { %573 = vst.msk [vmem:[%s249_s28] sm:$0x1] %vm572_vm8, %v571_v37 }
 0x190   : > { %929 = shalt.err (!%p926_p3)
}
 0x191   : > { %s930_s8 = scalar_lea.hbm %s1339_s7, 16  ;;  %s934_s9 = scalar_lea.hbm %s1385_s3, 64 }
 0x192   : > { %p931_p4 = scmp.ne.s32.totalorder %s1339_s7, %s930_s8  ;;  %p935_p7 = scmp.lt.u32.totalorder %s1339_s7, %s1385_s3 }
 0x193   : > { %p936_p8 = scmp.lt.u32.totalorder %s934_s9, %s930_s8  ;;  %p938_p6 = scmp.lt.u32.totalorder %s930_s8, %s1339_s7 }
 0x194   : > { %p932_p5 = pnand %p931_p4, %p1055_p9 }
 0x195   : > { %p937_p10 = por %p936_p8, %p935_p7 }
 0x196   : > { %p933_p2 = pneg %p932_p5 }
 0x197   : > { %p939_p13 = por %p938_p6, %p937_p10 }
 0x199   : > { %p940_p11 = pnand %p939_p13, %p933_p2 }
 0x19b   : > { %943 = shalt.err (!%p940_p11)
}
 0x19c   : > { %840 = dma.vmem_to_hbm [thread:$0]  (%p1055_p9), %s1341_s30, 16, %s1339_s7, %s575_s11  }
 0x19d PF: > { %p846_p12 = scmp.ge.s32.totalorder %s982_s15, 2  ;;  %s599_s25 = sand.u32 1, %s970_s12  }
 0x19e   : > { %p1407_p0 = scmp.ne.s32.totalorder %s1389_s24, 0  ;;  %s600_s26 = scalar_lea.sflag [#allocation4], %s599_s25 }
 0x1a0   : > { %p843_p1 = pnand %p846_p12, %p1407_p0 }
 0x1a2   : > { %965 = dma.done.wait (!%p843_p1), %s600_s26, 16  }
 0x1a3   : > { %967 = vsyncadd (!%p843_p1), %s600_s26, 4294967280  ;;  %p16_p3 = scmp.ge.s32.totalorder %s1036_s18, 6   ;;  %s1408_s12 = smov %s974_s13 }
 0x1a4   : > { %s1409_s13 = smov %s978_s14  ;;  %s1410_s14 = smov %s1048_s21 }
 0x1a5   : > { %s1411_s15 = smov %s1036_s18  ;;  %18 = sbr.rel (!%p16_p3) target bundleno = 5 (0x5), region = 83 }
 0x1ac   :  { %604 = vsyncpa [#allocation3], 1 }
 0x1ad   :  { %606 = vsyncpa [#allocation3 + $0x1], 1 }
 0x1ae   :  { %607 = vsyncpa [#allocation4], 1 }
 0x1af   :  { %609 = vsyncpa [#allocation4 + $0x1], 1 }

</bundles_post_ra>
